<compile_context>
chip_gen: v6e
topology: v6e:2x2x1
jax: 0.10.0
libtpu: 0.0.40
codegen_flags: <defaults>
</compile_context>

<pallas_src>
import jax
import jax.numpy as jnp
from jax.experimental import pallas as pl
from jax.experimental.pallas import tpu as pltpu

_LANES = 128
_SUBLANES = 8
_TILE_ROWS = 1024          # gridded-fallback tile: (1024, 128) f32 = 512 KiB
_GRIDLESS_MAX_ROWS = 2048  # slab <= 1 MiB each way -> single gridless block


def _probmask_kernel(slope_ref, mult_ref, out_ref):
    # slope_ref: (1,) f32 in SMEM ; mult_ref / out_ref: (rows, 128) f32 in VMEM.
    # logit_weights = zeros_like(x[..., 0:1]) + mult  ==  mult (broadcast later)
    out_ref[...] = jax.nn.sigmoid(slope_ref[0] * mult_ref[...])


def _slab_rows(n_elems):
    """Rows of the lane-dense slab holding n_elems, padded to layout rules."""
    rows = pl.cdiv(n_elems, _LANES)
    rows = pl.cdiv(rows, _SUBLANES) * _SUBLANES          # (8,128) vreg-dense
    if rows > _GRIDLESS_MAX_ROWS:
        rows = pl.cdiv(rows, _TILE_ROWS) * _TILE_ROWS    # exact tile grid
    return rows


def pack_mult_to_slab(mult):
    """One-time parameter packing: natural-shaped logits -> (rows, 128) slab.

    Done at init / parameter-load time, NOT per forward.
    """
    n = int(mult.size)
    rows = _slab_rows(n)
    flat = jnp.reshape(mult, (-1,)).astype(jnp.float32)
    flat = jnp.pad(flat, (0, rows * _LANES - n))
    return flat.reshape(rows, _LANES)


def probmask_forward(x, mult_slab, slope):
    """x: (B, ..., W) f32, mult_slab: (rows, 128) packed logits, slope: scalar.

    Returns sigmoid(slope * mult) broadcast to x.shape[:-1] + (1,), float32,
    matching PyTorch ProbMask.forward.
    """
    B = x.shape[0]
    plane_shape = tuple(x.shape[1:-1]) + (1,)        # shape of per-sample mask
    n = 1
    for d in plane_shape:
        n *= d

    rows = mult_slab.shape[0]
    assert mult_slab.shape == (rows, _LANES) and rows * _LANES >= n, \
        "mult_slab must be the packed (rows, 128) slab for this x shape"

    slope_arr = jnp.reshape(slope, (1,)).astype(jnp.float32)
    out_shape = jax.ShapeDtypeStruct((rows, _LANES), jnp.float32)

    if rows <= _GRIDLESS_MAX_ROWS:
        # Tiny/typical LOUPE plane: one gridless block, no per-step overhead.
        probs_slab = pl.pallas_call(
            _probmask_kernel,
            out_shape=out_shape,
            in_specs=[
                pl.BlockSpec(memory_space=pltpu.SMEM),          # scalar slope
                pl.BlockSpec((rows, _LANES), lambda: (0, 0)),   # lane-dense logits
            ],
            out_specs=pl.BlockSpec((rows, _LANES), lambda: (0, 0)),
        )(slope_arr, mult_slab)
    else:
        # Large-plane fallback: big tiles, 1-D "parallel" grid over rows
        # (>= 2 steps, so v7x shards across both TensorCores; tile sizing is
        # conservative w.r.t. v7x's 64 MiB physical / 32 MiB scoped VMEM).
        grid = (rows // _TILE_ROWS,)
        probs_slab = pl.pallas_call(
            _probmask_kernel,
            out_shape=out_shape,
            grid=grid,
            in_specs=[
                pl.BlockSpec(memory_space=pltpu.SMEM),
                pl.BlockSpec((_TILE_ROWS, _LANES), lambda i: (i, 0)),
            ],
            out_specs=pl.BlockSpec((_TILE_ROWS, _LANES), lambda i: (i, 0)),
            compiler_params=pltpu.CompilerParams(
                dimension_semantics=("parallel",)),
        )(slope_arr, mult_slab)

    # Wrapper-side layout plumbing only (fused by XLA under jit): un-pad,
    # restore the plane shape, then broadcast across the batch.
    probs = probs_slab.reshape(-1)[:n].reshape(plane_shape)
    return jnp.broadcast_to(probs[None], (B,) + plane_shape)


def init_probmask_params(key, x_shape, init_slope=1.0, eps=1e-4):
    """Deterministic synthetic init mirroring _logit_slope_random_uniform.

    Returns (mult_plane, mult_slab, slope): the natural-shaped logits (for
    reference math), the packed slab (the form the forward consumes), and the
    scalar slope.  Packing happens here, once, outside the hot path.
    """
    slope = jnp.abs(jnp.asarray(init_slope, dtype=jnp.float32))
    plane_shape = tuple(x_shape[1:-1]) + (1,)     # x.shape[1:] with last dim -> 1
    u = jax.random.uniform(key, plane_shape, dtype=jnp.float32,
                           minval=eps, maxval=1.0 - eps)
    mult = -jnp.log(1.0 / u - 1.0) / slope
    return mult, pack_mult_to_slab(mult), slope


if __name__ == "__main__":
    key = jax.random.PRNGKey(0)
    k_mult, k_x, k_mult2, k_x2 = jax.random.split(key, 4)

    # --- Primary check: small NCHW-style LOUPE input, gridless path. -------
    B, C, H, W = 2, 4, 16, 16
    x = jax.random.normal(k_x, (B, C, H, W), dtype=jnp.float32)
    mult, mult_slab, slope = init_probmask_params(k_mult, (B, C, H, W),
                                                  init_slope=1.0)

    fwd = jax.jit(probmask_forward)
    out = jax.block_until_ready(fwd(x, mult_slab, slope))

    ref = jax.nn.sigmoid(slope * (jnp.zeros_like(x[..., 0:1]) + mult))
    assert out.shape == (B, C, H, 1)
    assert out.dtype == jnp.float32
    assert jnp.allclose(out, ref, atol=1e-6), "mismatch vs reference (small)"

    # --- Secondary check: large plane exercises the gridded fallback. ------
    B2, C2, H2, W2 = 1, 512, 640, 2                 # plane = 327680 elems
    x2 = jax.random.normal(k_x2, (B2, C2, H2, W2), dtype=jnp.float32)
    mult2, mult_slab2, slope2 = init_probmask_params(k_mult2,
                                                     (B2, C2, H2, W2),
                                                     init_slope=2.0)
    assert mult_slab2.shape[0] > _GRIDLESS_MAX_ROWS  # really takes the grid path
    out2 = jax.block_until_ready(fwd(x2, mult_slab2, slope2))
    ref2 = jax.nn.sigmoid(slope2 * (jnp.zeros_like(x2[..., 0:1]) + mult2))
    assert out2.shape == (B2, C2, H2, 1)
    assert jnp.allclose(out2, ref2, atol=1e-6), "mismatch vs reference (large)"

    print("KERNEL_OK")
</pallas_src>

<mosaic_0001>
module attributes {stable_mosaic.version = 11 : i64} {
  func.func @_probmask_kernel(%arg0: memref<1xf32, #tpu.memory_space<smem>>, %arg1: memref<8x128xf32, #tpu.memory_space<vmem>>, %arg2: memref<8x128xf32, #tpu.memory_space<vmem>>) attributes {dimension_semantics = [], scalar_prefetch = 0 : i64, scratch_operands = 0 : i64, tpu.core_type = #tpu.core_type<tc>} {
    %c0 = arith.constant 0 : index
    %0 = memref.load %arg0[%c0] : memref<1xf32, #tpu.memory_space<smem>>
    %c0_0 = arith.constant 0 : index
    %c0_1 = arith.constant 0 : index
    %1 = vector.load %arg1[%c0_0, %c0_1] : memref<8x128xf32, #tpu.memory_space<vmem>>, vector<8x128xf32>
    %2 = vector.broadcast %0 : f32 to vector<8x128xf32>
    %3 = arith.mulf %2, %1 : vector<8x128xf32>
    %4 = arith.negf %3 : vector<8x128xf32>
    %5 = math.exp %4 : vector<8x128xf32>
    %cst = arith.constant 1.000000e+00 : f32
    %6 = vector.broadcast %cst : f32 to vector<8x128xf32>
    %7 = arith.addf %6, %5 : vector<8x128xf32>
    %8 = arith.divf %6, %7 : vector<8x128xf32>
    %c0_2 = arith.constant 0 : index
    %c0_3 = arith.constant 0 : index
    %9 = vector.load %arg2[%c0_2, %c0_3] : memref<8x128xf32, #tpu.memory_space<vmem>>, vector<8x128xf32>
    tpu.vector_store %arg2[%c0_2, %c0_3], %8 {strides = array<i32>} : memref<8x128xf32, #tpu.memory_space<vmem>>, vector<8x128xf32>,
    return
  }
}

</mosaic_0001>

<bundles_post_ra>
// kernel: probmask_forward.1
= control target key start
LH: loop header
LB: loop body
LE: loop exit
PB: predicated region body
PF: predicated region fallthrough
CT: control target
= control target key end

     0   :  { %8 = vsyncpa [#allocation4], 0  ;;  %s68_s9 = smov [#allocation3]   ;;  %s93_s0 = inlined_call_operand.<no memory space> [shape: f32[1], index: 0, kind: input, shape index: {}]   ;;  %s94_s1 = inlined_call_operand.hbm [shape: f32[8,128], index: 1, kind: input, shape index: {}]   ;;  %s95_s2 = inlined_call_operand.vmem [shape: f32[8,128], index: 2, kind: output, shape index: {}]  }
   0x1   :  { %s17_s10 = sshll.u32 %s68_s9, 4  ;;  %s18_s10 = int_to_ptr.vmem [resolvable:$true] %s17_s10 }
   0x2   :  { %s54_s11 = scalar_lea.vmem %s18_s10, 128  ;;  %p59_p1 = scmp.lt.s32.totalorder %s18_s10, %s18_s10 }
   0x3   :  { %p55_p0 = scmp.ne.s32.totalorder %s18_s10, %s54_s11  ;;  %p60_p2 = scmp.lt.s32.totalorder %s54_s11, %s54_s11 }
   0x5   :  { %p61_p3 = por %p60_p2, %p59_p1 }
   0x7   :  { %p62_p4 = pnand %p61_p3, %p55_p0 }
   0x9   :  { %65 = shalt.err (!%p62_p4)
}
   0xa   :  { %20 = dma.hbm_to_vmem [thread:$0]  %s94_s1, 128, %s18_s10, [#allocation4]  }
   0xb   :  { %66 = dma.done.wait [#allocation4], 128  }
   0xc   :  { %67 = vsyncadd [#allocation4], 4294967168  ;;  %v26_v0 = vstv %s93_s0  ;;  %v25_v1 = vld [vmem:[#allocation3] sm:$0xff] }
   0xd   :  { %v27_v2 = vmul.f32 %v26_v0, %v25_v1 }
   0xf   :  { %v40_v3 = vmul.f32 -1.442695, %v27_v2 }
  0x11   :  { %42 = vpow2.f32 %v40_v3 }
  0x1e   :  { %v43_v4 = vpop.eup %42 }
  0x1f   :  { %v31_v5 = vadd.f32 1.0, %v43_v4 }
  0x21   :  { %44 = vrcp.f32 %v31_v5 }
  0x2e   :  { %v45_v6 = vpop.eup %44 }
  0x2f   :  { %34 = vst [vmem:[%s95_s2] sm:$0xff] %v45_v6 }
  0x30   :  { %39 = vsyncpa [#allocation4], 1 }

</bundles_post_ra>
